<compile_context>
chip_gen: v7x
topology: tpu7x:2x2x1
jax: 0.10.0
libtpu: 0.0.40
codegen_flags: <defaults>
</compile_context>

<pallas_src>
import functools

import jax
import jax.numpy as jnp
from jax.experimental import pallas as pl
from jax.experimental.pallas import tpu as pltpu


def _mean_distance_kernel(a_ref, b_ref, o_ref):
    # a_ref, b_ref: (tm, D) input tiles in VMEM;  o_ref: (1, 1, tm) lane-dense output.
    tm, d = a_ref.shape
    a = a_ref[...].astype(jnp.float32)
    b = b_ref[...].astype(jnp.float32)
    diff = a - b
    sq = diff * diff                                    # (tm, D)  -- VPU
    # Row-sums via MXU: contract D of a ones row against D of sq -> (1, tm).
    # This puts the per-row results on the lane axis (lane-dense store) and the
    # f32 accumulation happens inside the MXU, which is otherwise idle here.
    ones = jnp.ones((1, d), jnp.float32)
    ssum = jax.lax.dot_general(
        ones, sq,
        dimension_numbers=(((1,), (1,)), ((), ())),
        preferred_element_type=jnp.float32)             # (1, tm)
    rms = jnp.sqrt(ssum * (1.0 / d))                    # mean + sqrt (EUP/VPU)
    o_ref[...] = rms.astype(o_ref.dtype).reshape(1, 1, tm)


def _round_up(x, m):
    return ((x + m - 1) // m) * m


def _choose_tm(m_rows, d, a_dtype, b_dtype):
    """Pick the largest sublane-aligned row tile whose double-buffered inputs
    fit a conservative VMEM budget (safe on v5e/v6e/v7x)."""
    a_item = jnp.dtype(a_dtype).itemsize
    b_item = jnp.dtype(b_dtype).itemsize

    def _align(itemsize):
        # min sublane multiple: f32 -> 8, bf16/f16 -> 16, int8/fp8 -> 32
        return {4: 8, 2: 16, 1: 32}.get(itemsize, 8)

    row_align = max(_align(a_item), _align(b_item))
    budget = 24 * 1024 * 1024                 # bytes for double-buffered inputs
    bytes_per_row = (a_item + b_item) * d
    cap = budget // (2 * max(1, bytes_per_row))
    tm = max(row_align, min(4096, cap))
    if tm >= 128:
        tm = (tm // 128) * 128                # lane-friendly multiple -> dense vst
    else:
        tm = max(row_align, (tm // row_align) * row_align)
    # Don't allocate more rows than the (aligned) problem actually has.
    tm = min(tm, _round_up(m_rows, row_align))
    return tm


@functools.partial(jax.jit, static_argnames=("dim", "tm"))
def mean_distance(a, b, dim=-1, tm=None):
    assert a.shape == b.shape, "a and b must have the same shape"
    ndim = a.ndim
    axis = dim % ndim

    # Glue: move the reduction axis last, flatten the rest into rows.
    # NOTE: when dim != -1 this moveaxis is a full HBM transpose of both inputs
    # (extra bandwidth) -- unavoidable without a dedicated strided-DMA kernel.
    if axis != ndim - 1:
        a = jnp.moveaxis(a, axis, -1)
        b = jnp.moveaxis(b, axis, -1)
    lead_shape = a.shape[:-1]
    D = a.shape[-1]
    M = 1
    for s in lead_shape:
        M *= s
    a2 = a.reshape(M, D)
    b2 = b.reshape(M, D)

    if tm is None:
        tm = _choose_tm(M, D, a2.dtype, b2.dtype)
    num_tiles = pl.cdiv(M, tm)

    # Force a floating output dtype (torch returns float; int sqrt would truncate).
    out_dtype = jnp.promote_types(a.dtype, b.dtype)
    if not jnp.issubdtype(out_dtype, jnp.floating):
        out_dtype = jnp.float32

    out = pl.pallas_call(
        _mean_distance_kernel,
        out_shape=jax.ShapeDtypeStruct((num_tiles, 1, tm), out_dtype),
        grid_spec=pltpu.PrefetchScalarGridSpec(
            num_scalar_prefetch=0,
            grid=(num_tiles,),
            in_specs=[
                pl.BlockSpec((tm, D), lambda i: (i, 0)),
                pl.BlockSpec((tm, D), lambda i: (i, 0)),
            ],
            # (1, tm) last-two dims match the full array dims -> valid tiling,
            # and the tm-wide lane-dense row avoids masked 1-lane column stores.
            out_specs=pl.BlockSpec((1, 1, tm), lambda i: (i, 0, 0)),
        ),
        compiler_params=pltpu.CompilerParams(
            dimension_semantics=("parallel",),          # megacore sharding on v7x
            vmem_limit_bytes=48 * 1024 * 1024,          # above v5e/v6e scoped default,
                                                        # within v7x 64 MiB physical
        ),
    )(a2, b2)

    # Ragged-tail rows (beyond M) were computed on padded garbage; slice them off.
    out = out.reshape(num_tiles * tm)[:M].reshape(lead_shape)
    return out


def _reference(a, b, dim=-1):
    c = a.astype(jnp.float32) - b.astype(jnp.float32)
    return jnp.sqrt(jnp.mean(c * c, axis=dim))


if __name__ == "__main__":
    key = jax.random.PRNGKey(0)
    ka, kb = jax.random.split(key)
    # batch=2, seq=8, hidden=32  (reduce over hidden, dim=-1)
    a = jax.random.normal(ka, (2, 8, 32), dtype=jnp.float32)
    b = jax.random.normal(kb, (2, 8, 32), dtype=jnp.float32)

    out = mean_distance(a, b, dim=-1)
    out = jax.block_until_ready(out)
    ref = _reference(a, b, dim=-1)
    assert out.shape == ref.shape, (out.shape, ref.shape)
    assert jnp.allclose(out, ref, atol=1e-5, rtol=1e-5), "mismatch vs reference (dim=-1)"

    # Exercise the non-trailing-dim path (reduce over seq, dim=1).
    out1 = mean_distance(a, b, dim=1)
    out1 = jax.block_until_ready(out1)
    ref1 = _reference(a, b, dim=1)
    assert out1.shape == ref1.shape, (out1.shape, ref1.shape)
    assert jnp.allclose(out1, ref1, atol=1e-5, rtol=1e-5), "mismatch vs reference (dim=1)"

    print("KERNEL_OK")
</pallas_src>

<mosaic_0001>
module attributes {stable_mosaic.version = 11 : i64} {
  func.func @_mean_distance_kernel(%arg0: i32, %arg1: memref<16x32xf32, #tpu.memory_space<vmem>>, %arg2: memref<16x32xf32, #tpu.memory_space<vmem>>, %arg3: memref<1x1x16xf32, #tpu.memory_space<vmem>>) attributes {dimension_semantics = [#tpu.dimension_semantics<parallel>], iteration_bounds = array<i64: 1>, scalar_prefetch = 0 : i64, scratch_operands = 0 : i64, tpu.core_type = #tpu.core_type<tc>, window_params = [{transform_indices = @transform_0, window_bounds = array<i64: 16, 32>}, {transform_indices = @transform_1, window_bounds = array<i64: 16, 32>}, {transform_indices = @transform_2, window_bounds = array<i64: 1, 1, 16>}]} {
    %c0 = arith.constant 0 : index
    %c0_0 = arith.constant 0 : index
    %0 = vector.load %arg1[%c0, %c0_0] : memref<16x32xf32, #tpu.memory_space<vmem>>, vector<16x32xf32>
    %c0_1 = arith.constant 0 : index
    %c0_2 = arith.constant 0 : index
    %1 = vector.load %arg2[%c0_1, %c0_2] : memref<16x32xf32, #tpu.memory_space<vmem>>, vector<16x32xf32>
    %2 = arith.subf %0, %1 : vector<16x32xf32>
    %3 = arith.mulf %2, %2 : vector<16x32xf32>
    %cst = arith.constant 1.000000e+00 : f32
    %4 = vector.broadcast %cst : f32 to vector<1x32xf32>
    %cst_3 = arith.constant dense<0.000000e+00> : vector<1x16xf32>
    %5 = tpu.matmul %4, %3, %cst_3 {dimension_numbers = #tpu.dot_dimension_numbers<[1], [1], [0], [0], [0, 0, 1, 0], [], []>} : vector<1x32xf32>, vector<16x32xf32>, vector<1x16xf32> -> vector<1x16xf32>
    %cst_4 = arith.constant 3.125000e-02 : f32
    %6 = vector.broadcast %cst_4 : f32 to vector<1x16xf32>
    %7 = arith.mulf %5, %6 : vector<1x16xf32>
    %8 = math.sqrt %7 : vector<1x16xf32>
    %9 = vector.shape_cast %8 : vector<1x16xf32> to vector<1x1x16xf32>
    %c0_5 = arith.constant 0 : index
    %c0_6 = arith.constant 0 : index
    %c0_7 = arith.constant 0 : index
    %10 = vector.load %arg3[%c0_5, %c0_6, %c0_7] : memref<1x1x16xf32, #tpu.memory_space<vmem>>, vector<1x1x16xf32>
    tpu.vector_store %arg3[%c0_5, %c0_6, %c0_7], %9 {strides = array<i32>} : memref<1x1x16xf32, #tpu.memory_space<vmem>>, vector<1x1x16xf32>,
    return
  }
  func.func @transform_0(%arg0: i32) -> (i32, i32) {
    %c0_i32 = arith.constant 0 : i32
    %c0_i32_0 = arith.constant 0 : i32
    return %arg0, %c0_i32 : i32, i32
  }
  func.func @transform_1(%arg0: i32) -> (i32, i32) {
    %c0_i32 = arith.constant 0 : i32
    %c0_i32_0 = arith.constant 0 : i32
    return %arg0, %c0_i32 : i32, i32
  }
  func.func @transform_2(%arg0: i32) -> (i32, i32, i32) {
    %c0_i32 = arith.constant 0 : i32
    %c0_i32_0 = arith.constant 0 : i32
    %c0_i32_1 = arith.constant 0 : i32
    return %arg0, %c0_i32, %c0_i32_0 : i32, i32, i32
  }
}

</mosaic_0001>

<bundles_post_ra>
// kernel: mean_distance.1
= control target key start
LH: loop header
LB: loop body
LE: loop exit
PB: predicated region body
PF: predicated region fallthrough
CT: control target
= control target key end

     0   :  { %7 = vsyncpa [#allocation3], 0  ;;  %s268_s0 = inlined_call_operand.hbm [shape: f32[16,32], index: 0, kind: input, shape index: {}]   ;;  %s269_s1 = inlined_call_operand.hbm [shape: f32[16,32], index: 1, kind: input, shape index: {}]   ;;  %s270_s2 = inlined_call_operand.vmem [shape: f32[1,1,16], index: 2, kind: output, shape index: {}]  }
   0x1   :  { %8 = vsyncpa [#allocation5], 0  ;;  %s218_s9 = smov [#allocation2]   ;;  %s170_s13 = scalar_lea.hbm %s268_s0, 256 }
   0x2   :  { %s14_s10 = sshll.u32 %s218_s9, 4  ;;  %p171_p0 = scmp.ne.s32.totalorder %s268_s0, %s170_s13  ;;  %s15_s10 = int_to_ptr.vmem [resolvable:$true] %s14_s10 }
   0x3   :  { %p174_p1 = scmp.lt.u32.totalorder %s170_s13, %s268_s0 }
   0x5   :  { %p176_p2 = pnand %p174_p1, %p171_p0 }
   0x7   :  { %179 = shalt.err (!%p176_p2)
}
   0x8   :  { %s180_s18 = scalar_lea.vmem %s15_s10, 256  ;;  %p185_p4 = scmp.lt.s32.totalorder %s15_s10, %s15_s10 }
   0x9   :  { %p181_p3 = scmp.ne.s32.totalorder %s15_s10, %s180_s18  ;;  %p186_p5 = scmp.lt.s32.totalorder %s180_s18, %s180_s18 }
   0xb   :  { %p187_p6 = por %p186_p5, %p185_p4 }
   0xd   :  { %p188_p7 = pnand %p187_p6, %p181_p3 }
   0xf   :  { %191 = shalt.err (!%p188_p7)
}
  0x10   :  { %s219_s19 = smov 128   ;;  %s220_s20 = smov 8  }
  0x11   :  { %20 = dma.hbm_to_vmem [thread:$0]  %s268_s0, 256, %s15_s10, [#allocation3], %s219_s19, %s219_s19, %s220_s20  }
  0x12   :  { %s221_s23 = smov [#allocation4]   ;;  %s192_s27 = scalar_lea.hbm %s269_s1, 256 }
  0x13   :  { %s26_s24 = sshll.u32 %s221_s23, 4  ;;  %p193_p8 = scmp.ne.s32.totalorder %s269_s1, %s192_s27  ;;  %s27_s24 = int_to_ptr.vmem [resolvable:$true] %s26_s24 }
  0x14   :  { %p196_p9 = scmp.lt.u32.totalorder %s192_s27, %s269_s1 }
  0x16   :  { %p198_p10 = pnand %p196_p9, %p193_p8 }
  0x18   :  { %201 = shalt.err (!%p198_p10)
}
  0x19   :  { %s202_s4 = scalar_lea.vmem %s27_s24, 256  ;;  %p207_p12 = scmp.lt.s32.totalorder %s27_s24, %s27_s24 }
  0x1a   :  { %p203_p11 = scmp.ne.s32.totalorder %s27_s24, %s202_s4  ;;  %p208_p13 = scmp.lt.s32.totalorder %s202_s4, %s202_s4 }
  0x1c   :  { %p209_p0 = por %p208_p13, %p207_p12 }
  0x1e   :  { %p210_p1 = pnand %p209_p0, %p203_p11 }
  0x20   :  { %213 = shalt.err (!%p210_p1)
}
  0x21   :  { %32 = dma.hbm_to_vmem [thread:$0]  %s269_s1, 256, %s27_s24, [#allocation5], %s219_s19, %s219_s19, %s220_s20  }
  0x22   :  { %214 = dma.done.wait [#allocation3], 256  }
  0x23   :  { %215 = vsyncadd [#allocation3], 4294967040 }
  0x24   :  { %216 = dma.done.wait [#allocation5], 256  }
  0x25   :  { %217 = vsyncadd [#allocation5], 4294967040  ;;  %v222_v0 = vmov 0.0|0.0   ;;  %vm223_vm0 = vmmov 0   ;;  %v224_v1 = vmov 0.0   ;;  %v39_v2 = vld [vmem:[#allocation2] sm:$0xff] }
  0x26   :  { %156 = vmatprep.subr.bf16.mxu0 %v222_v0  ;;  %153 = vmatprep.mubr.msk.f32.mxu0 %vm223_vm0, %v224_v1  ;;  %v40_v3 = vld [vmem:[#allocation2 + $0x8] sm:$0xff]  ;;  %v41_v4 = vld [vmem:[#allocation4] sm:$0xff]  ;;  %v42_v5 = vld [vmem:[#allocation4 + $0x8] sm:$0xff]  ;;  %vm47_vm1 = vcmask 261120   ;;  %v225_v11 = vmov 1.0   ;;  %vm135_vm4 = vcmask 122880  }
  0x27   :  { %v43_v6 = vsub.f32 %v39_v2, %v41_v4  ;;  %v44_v7 = vsub.f32 %v40_v3, %v42_v5  ;;  %vm158_vm2 = vmpackc.low %vm47_vm1, %vm47_vm1 }
  0x29   :  { %v45_v8 = vmul.f32 %v43_v6, %v43_v6  ;;  %v46_v9 = vmul.f32 %v44_v7, %v44_v7 }
  0x2b   :  { %v157_v10 = vpack.c.bf16 %v46_v9, %v45_v8 }
  0x2d   :  { %159 = vmatpush3.bf16.xpose.msk.msra.mxu0 %vm158_vm2, %v157_v10 }
  0x34   :  { %154 = vmatmul.mubr.msk.f32.vlgmr.msra.gmra.mrb[0].mxu0 %vm47_vm1, %v225_v11 }
 0x107   :  { %v123_v12 = vpop.f32.mrb[0].mxu0 }
 0x108   :  { %v127_v13 = vmul.f32 0.03125, %v123_v12  ;;  %v155_v14 = vpop.f32.mrb[1].mxu0 }
 0x10a   :  { %168 = vrsqrt.f32 %v127_v13  ;;  %vm130_vm3 = vcmp.eq.f32.partialorder %v127_v13, inf  ;;  %v133_v17 = vand.u32 2147483648, %v127_v13  ;;  %vm132_vm5 = vcmp.eq.f32.partialorder %v127_v13, 0.0 }
 0x114   :  { %v169_v15 = vpop.eup %168 }
 0x115   :  { %v129_v16 = vmul.f32 %v169_v15, %v127_v13 }
 0x117   :  { %v131_v18 = vsel %vm130_vm3, %v127_v13, %v129_v16 }
 0x118   :  { %v134_v19 = vsel %vm132_vm5, %v133_v17, %v131_v18 }
 0x119   :  { %136 = vst.msk [vmem:[%s270_s2] sm:$0x1] %vm135_vm4, %v134_v19 }
 0x11a   :  { %141 = vsyncpa [#allocation3], 1 }
 0x11b   :  { %142 = vsyncpa [#allocation5], 1 }

</bundles_post_ra>
